<compile_context>
chip_gen: v5e
topology: v5e:2x2
jax: 0.10.0
libtpu: 0.0.40
codegen_flags: <defaults>
</compile_context>

<pallas_src>
from functools import partial

import jax
import jax.numpy as jnp
from jax.experimental import pallas as pl
from jax.experimental.pallas import tpu as pltpu

BATCH = 256          # total samples
IN_FEATURES = 128    # input feature dim (lane-friendly)
HIDDEN = 128         # hidden dim
NUM_CLASSES = 10     # real classifier width
PADDED_CLASSES = 128 # lane-dense padded output width


def mlp_forward_kernel(x_ref, w1_ref, b1_ref, w2_ref, b2_ref, o_ref):
    # Cast activations to bf16 in-kernel (VPU, hidden under the MXU).
    x = x_ref[...].astype(jnp.bfloat16)
    # Layer 1: x @ W1 (bf16 x bf16 -> f32 on MXU), bias + ReLU in f32.
    h = jnp.dot(x, w1_ref[...], preferred_element_type=jnp.float32)
    h = jnp.maximum(h + b1_ref[...], 0.0)          # (1,H) bias broadcasts over rows
    # Layer 2: h @ W2_padded -> (tb, 128) lane-dense logits slab.
    logits = jnp.dot(h.astype(jnp.bfloat16), w2_ref[...],
                     preferred_element_type=jnp.float32)
    o_ref[...] = (logits + b2_ref[...]).astype(o_ref.dtype)


def prepare_params(w1, b1, w2, b2):
    """One-time parameter prep (padding + bf16 casts); NOT in the per-call path."""
    H, C = w2.shape
    w2_p = jnp.zeros((H, PADDED_CLASSES), jnp.float32).at[:, :C].set(w2)
    b2_p = jnp.zeros((1, PADDED_CLASSES), jnp.float32).at[:, :C].set(b2)
    return (w1.astype(jnp.bfloat16), b1.astype(jnp.float32),
            w2_p.astype(jnp.bfloat16), b2_p)


@partial(jax.jit, static_argnames=("tb",))
def mlp_forward(x, w1_bf, b1, w2_bf, b2_p, *, tb=None):
    """x:(B,F) f32; prepared params from prepare_params(); returns (B,10) f32 logits."""
    B, F = x.shape
    H = w1_bf.shape[1]
    CP = w2_bf.shape[1]
    if tb is None:
        tb = B                      # single grid step: whole problem fits VMEM easily
    assert B % tb == 0, "batch must be a multiple of the batch tile"

    out = pl.pallas_call(
        mlp_forward_kernel,
        out_shape=jax.ShapeDtypeStruct((B, CP), jnp.float32),
        grid=(B // tb,),
        in_specs=[
            pl.BlockSpec((tb, F), lambda i: (i, 0)),   # batch-tiled activations (f32)
            pl.BlockSpec((F, H), lambda i: (0, 0)),    # W1 resident (bf16)
            pl.BlockSpec((1, H), lambda i: (0, 0)),    # b1 resident (f32)
            pl.BlockSpec((H, CP), lambda i: (0, 0)),   # W2 padded resident (bf16)
            pl.BlockSpec((1, CP), lambda i: (0, 0)),   # b2 padded resident (f32)
        ],
        out_specs=pl.BlockSpec((tb, CP), lambda i: (i, 0)),
        compiler_params=pltpu.CompilerParams(
            # Only matters when tb < B (e.g. v7x A/B with tb=128 -> 2 TC shards).
            dimension_semantics=("parallel",)),
    )(x, w1_bf, b1, w2_bf, b2_p)

    return out[:, :NUM_CLASSES]


def init_params(key):
    k1, k2 = jax.random.split(key, 2)
    w1 = jax.random.normal(k1, (IN_FEATURES, HIDDEN), jnp.float32) * (2.0 / IN_FEATURES) ** 0.5
    b1 = jnp.zeros((1, HIDDEN), jnp.float32)
    w2 = jax.random.normal(k2, (HIDDEN, NUM_CLASSES), jnp.float32) * (2.0 / HIDDEN) ** 0.5
    b2 = jnp.zeros((1, NUM_CLASSES), jnp.float32)
    return w1, b1, w2, b2


if __name__ == "__main__":
    key = jax.random.PRNGKey(0)
    kx, kp = jax.random.split(key)
    x = jax.random.normal(kx, (BATCH, IN_FEATURES), jnp.float32)
    w1, b1, w2, b2 = init_params(kp)

    # One-time parameter prep (padding + casts) outside the per-call path.
    params = prepare_params(w1, b1, w2, b2)

    # Default: single 256-row grid step.
    logits = mlp_forward(x, *params)
    jax.block_until_ready(logits)
    assert logits.shape == (BATCH, NUM_CLASSES)

    # Also exercise the batch-tiled variant (v7x 2-TC split) for correctness.
    logits_tiled = mlp_forward(x, *params, tb=128)
    jax.block_until_ready(logits_tiled)

    # Reference mirroring the kernel's bf16-in / f32-accumulate numerics.
    h_ref = jnp.maximum(
        jnp.dot(x.astype(jnp.bfloat16), w1.astype(jnp.bfloat16),
                preferred_element_type=jnp.float32) + b1, 0.0)
    ref = jnp.dot(h_ref.astype(jnp.bfloat16), w2.astype(jnp.bfloat16),
                  preferred_element_type=jnp.float32) + b2
    assert jnp.allclose(logits, ref, atol=2e-2, rtol=2e-2)
    assert jnp.allclose(logits_tiled, ref, atol=2e-2, rtol=2e-2)

    print("KERNEL_OK")
</pallas_src>

<mosaic_0001>
module attributes {stable_mosaic.version = 11 : i64} {
  func.func @mlp_forward_kernel(%arg0: i32, %arg1: memref<256x128xf32, #tpu.memory_space<vmem>>, %arg2: memref<128x128xbf16, #tpu.memory_space<vmem>>, %arg3: memref<1x128xf32, #tpu.memory_space<vmem>>, %arg4: memref<128x128xbf16, #tpu.memory_space<vmem>>, %arg5: memref<1x128xf32, #tpu.memory_space<vmem>>, %arg6: memref<256x128xf32, #tpu.memory_space<vmem>>) attributes {dimension_semantics = [#tpu.dimension_semantics<parallel>], iteration_bounds = array<i64: 1>, scalar_prefetch = 0 : i64, scratch_operands = 0 : i64, tpu.core_type = #tpu.core_type<tc>, window_params = [{transform_indices = @transform_0, window_bounds = array<i64: 256, 128>}, {pipeline_mode = #tpu.pipeline_mode<synchronous>, transform_indices = @transform_1, window_bounds = array<i64: 128, 128>}, {pipeline_mode = #tpu.pipeline_mode<synchronous>, transform_indices = @transform_2, window_bounds = array<i64: 1, 128>}, {pipeline_mode = #tpu.pipeline_mode<synchronous>, transform_indices = @transform_3, window_bounds = array<i64: 128, 128>}, {pipeline_mode = #tpu.pipeline_mode<synchronous>, transform_indices = @transform_4, window_bounds = array<i64: 1, 128>}, {transform_indices = @transform_5, window_bounds = array<i64: 256, 128>}]} {
    %c0 = arith.constant 0 : index
    %c0_0 = arith.constant 0 : index
    %0 = vector.load %arg1[%c0, %c0_0] : memref<256x128xf32, #tpu.memory_space<vmem>>, vector<256x128xf32>
    %1 = arith.truncf %0 : vector<256x128xf32> to vector<256x128xbf16>
    %c0_1 = arith.constant 0 : index
    %c0_2 = arith.constant 0 : index
    %2 = vector.load %arg2[%c0_1, %c0_2] : memref<128x128xbf16, #tpu.memory_space<vmem>>, vector<128x128xbf16>
    %cst = arith.constant dense<0.000000e+00> : vector<256x128xf32>
    %3 = tpu.matmul %1, %2, %cst {dimension_numbers = #tpu.dot_dimension_numbers<[1], [0], [0], [1], [0, 0, 1, 1], [], []>} : vector<256x128xbf16>, vector<128x128xbf16>, vector<256x128xf32> -> vector<256x128xf32>
    %c0_3 = arith.constant 0 : index
    %c0_4 = arith.constant 0 : index
    %4 = vector.load %arg3[%c0_3, %c0_4] : memref<1x128xf32, #tpu.memory_space<vmem>>, vector<1x128xf32>
    %5 = vector.broadcast %4 : vector<1x128xf32> to vector<256x128xf32>
    %6 = arith.addf %3, %5 : vector<256x128xf32>
    %cst_5 = arith.constant 0.000000e+00 : f32
    %7 = vector.broadcast %cst_5 : f32 to vector<256x128xf32>
    %8 = arith.maximumf %6, %7 : vector<256x128xf32>
    %9 = arith.truncf %8 : vector<256x128xf32> to vector<256x128xbf16>
    %c0_6 = arith.constant 0 : index
    %c0_7 = arith.constant 0 : index
    %10 = vector.load %arg4[%c0_6, %c0_7] : memref<128x128xbf16, #tpu.memory_space<vmem>>, vector<128x128xbf16>
    %cst_8 = arith.constant dense<0.000000e+00> : vector<256x128xf32>
    %11 = tpu.matmul %9, %10, %cst_8 {dimension_numbers = #tpu.dot_dimension_numbers<[1], [0], [0], [1], [0, 0, 1, 1], [], []>} : vector<256x128xbf16>, vector<128x128xbf16>, vector<256x128xf32> -> vector<256x128xf32>
    %c0_9 = arith.constant 0 : index
    %c0_10 = arith.constant 0 : index
    %12 = vector.load %arg5[%c0_9, %c0_10] : memref<1x128xf32, #tpu.memory_space<vmem>>, vector<1x128xf32>
    %13 = vector.broadcast %12 : vector<1x128xf32> to vector<256x128xf32>
    %14 = arith.addf %11, %13 : vector<256x128xf32>
    %c0_11 = arith.constant 0 : index
    %c0_12 = arith.constant 0 : index
    %15 = vector.load %arg6[%c0_11, %c0_12] : memref<256x128xf32, #tpu.memory_space<vmem>>, vector<256x128xf32>
    tpu.vector_store %arg6[%c0_11, %c0_12], %14 {strides = array<i32>} : memref<256x128xf32, #tpu.memory_space<vmem>>, vector<256x128xf32>,
    return
  }
  func.func @transform_0(%arg0: i32) -> (i32, i32) {
    %c0_i32 = arith.constant 0 : i32
    %c0_i32_0 = arith.constant 0 : i32
    return %arg0, %c0_i32 : i32, i32
  }
  func.func @transform_1(%arg0: i32) -> (i32, i32) {
    %c0_i32 = arith.constant 0 : i32
    %c0_i32_0 = arith.constant 0 : i32
    %c0_i32_1 = arith.constant 0 : i32
    return %c0_i32, %c0_i32_0 : i32, i32
  }
  func.func @transform_2(%arg0: i32) -> (i32, i32) {
    %c0_i32 = arith.constant 0 : i32
    %c0_i32_0 = arith.constant 0 : i32
    %c0_i32_1 = arith.constant 0 : i32
    return %c0_i32, %c0_i32_0 : i32, i32
  }
  func.func @transform_3(%arg0: i32) -> (i32, i32) {
    %c0_i32 = arith.constant 0 : i32
    %c0_i32_0 = arith.constant 0 : i32
    %c0_i32_1 = arith.constant 0 : i32
    return %c0_i32, %c0_i32_0 : i32, i32
  }
  func.func @transform_4(%arg0: i32) -> (i32, i32) {
    %c0_i32 = arith.constant 0 : i32
    %c0_i32_0 = arith.constant 0 : i32
    %c0_i32_1 = arith.constant 0 : i32
    return %c0_i32, %c0_i32_0 : i32, i32
  }
  func.func @transform_5(%arg0: i32) -> (i32, i32) {
    %c0_i32 = arith.constant 0 : i32
    %c0_i32_0 = arith.constant 0 : i32
    return %arg0, %c0_i32 : i32, i32
  }
}

</mosaic_0001>

<bundles_post_ra>
// kernel: mlp_forward.1
= control target key start
LH: loop header
LB: loop body
LE: loop exit
PB: predicated region body
PF: predicated region fallthrough
CT: control target
= control target key end

     0   :  { %10 = vsyncpa [#allocation3], 0  ;;  %s912_s0 = inlined_call_operand.hbm [shape: f32[256,128], index: 0, kind: input, shape index: {}]   ;;  %s913_s1 = inlined_call_operand.hbm [shape: bf16[128,128], index: 1, kind: input, shape index: {}]   ;;  %s914_s2 = inlined_call_operand.vmem [shape: f32[1,128], index: 2, kind: input, shape index: {}]   ;;  %s915_s3 = inlined_call_operand.hbm [shape: bf16[128,128], index: 3, kind: input, shape index: {}]   ;;  %s916_s4 = inlined_call_operand.vmem [shape: f32[1,128], index: 4, kind: input, shape index: {}]   ;;  %s917_s5 = inlined_call_operand.vmem [shape: f32[256,128], index: 5, kind: output, shape index: {}]  }
   0x1   :  { %11 = vsyncpa [#allocation5], 0  ;;  %s29_s20 = sshll.u32 %s913_s1, 4  ;;  %s696_s21 = smov [#allocation4]   ;;  %s30_s20 = int_to_ptr.hbm [resolvable:$true] %s29_s20 }
   0x2   :  { %s31_s22 = sshll.u32 %s696_s21, 4  ;;  %s16_s25 = sshll.u32 %s912_s0, 4  ;;  %s32_s22 = int_to_ptr.vmem [resolvable:$true] %s31_s22  ;;  %s17_s25 = int_to_ptr.hbm [resolvable:$true] %s16_s25 }
   0x3   :  { %s697_s26 = smov 64   ;;  %s698_s27 = smov 4  }
   0x4   :  { %37 = dma.hbm_to_vmem [thread:$0]  %s30_s20, 1024, %s32_s22, [#allocation5], %s697_s26, %s697_s26, %s698_s27  }
   0x5   :  { %s699_s28 = smov [#allocation2]   ;;  %s700_s30 = smov 128  }
   0x6   :  { %s18_s29 = sshll.u32 %s699_s28, 4  ;;  %s701_s6 = smov 8   ;;  %s19_s29 = int_to_ptr.vmem [resolvable:$true] %s18_s29 }
   0x7   :  { %24 = dma.hbm_to_vmem [thread:$0]  %s17_s25, 4096, %s19_s29, [#allocation3], %s700_s30, %s700_s30, %s701_s6  }
   0x8   :  { %s44_s8 = sshll.u32 %s915_s3, 4  ;;  %s702_s9 = smov [#allocation6]   ;;  %s45_s8 = int_to_ptr.hbm [resolvable:$true] %s44_s8 }
   0x9   :  { %s46_s10 = sshll.u32 %s702_s9, 4  ;;  %s47_s10 = int_to_ptr.vmem [resolvable:$true] %s46_s10 }
   0xa   :  { %52 = dma.hbm_to_vmem [thread:$0]  %s45_s8, 1024, %s47_s10, [#allocation5], %s697_s26, %s697_s26, %s698_s27  }
   0xb   :  { %692 = dma.done.wait [#allocation3], 4096  }
   0xc   :  { %693 = vsyncadd [#allocation3], 4294963200 }
   0xd   :  { %694 = dma.done.wait [#allocation5], 2048  }
   0xe   :  { %695 = vsyncadd [#allocation5], 4294965248  ;;  %v586_v0 = vld [vmem:[#allocation4 + $0x38] sm:$0xff]  ;;  %v585_v1 = vld [vmem:[#allocation4 + $0x30] sm:$0xff] }
   0xf   :  { %183 = vmatpush.bf16.msra.mxu0 %v586_v0  ;;  %595 = vmatpush.bf16.msra.mxu2 %v586_v0  ;;  %v584_v2 = vld [vmem:[#allocation4 + $0x28] sm:$0xff]  ;;  %v583_v3 = vld [vmem:[#allocation4 + $0x20] sm:$0xff]  ;;  %v582_v4 = vld [vmem:[#allocation4 + $0x18] sm:$0xff] }
  0x10   :  { %v581_v5 = vld [vmem:[#allocation4 + $0x10] sm:$0xff]  ;;  %v580_v6 = vld [vmem:[#allocation4 + $0x8] sm:$0xff]  ;;  %v579_v7 = vld [vmem:[#allocation4] sm:$0xff] }
  0x11   :  { %v67_v8 = vld [vmem:[#allocation2] sm:$0xff]  ;;  %v68_v9 = vld [vmem:[#allocation2 + $0x8] sm:$0xff]  ;;  %v69_v14 = vld [vmem:[#allocation2 + $0x10] sm:$0xff] }
  0x12   :  { %v83_v10 = vld [vmem:[#allocation2 + $0x80] sm:$0xff]  ;;  %v84_v11 = vld [vmem:[#allocation2 + $0x88] sm:$0xff]  ;;  %v99_v12 = vpack.c.bf16 %v68_v9, %v67_v8  ;;  %v70_v15 = vld [vmem:[#allocation2 + $0x18] sm:$0xff] }
  0x13   :  { %184 = vmatpush.bf16.msra.mxu0 %v585_v1  ;;  %596 = vmatpush.bf16.msra.mxu2 %v585_v1  ;;  %v107_v13 = vpack.c.bf16 %v84_v11, %v83_v10  ;;  %v85_v16 = vld [vmem:[#allocation2 + $0x90] sm:$0xff]  ;;  %v86_v17 = vld [vmem:[#allocation2 + $0x98] sm:$0xff]  ;;  %v100_v18 = vpack.c.bf16 %v70_v15, %v69_v14  ;;  %v71_v20 = vld [vmem:[#allocation2 + $0x20] sm:$0xff] }
  0x14   :  { %v108_v19 = vpack.c.bf16 %v86_v17, %v85_v16  ;;  %v72_v21 = vld [vmem:[#allocation2 + $0x28] sm:$0xff]  ;;  %v87_v22 = vld [vmem:[#allocation2 + $0xa0] sm:$0xff]  ;;  %v73_v26 = vld [vmem:[#allocation2 + $0x30] sm:$0xff] }
  0x15   :  { %v88_v23 = vld [vmem:[#allocation2 + $0xa8] sm:$0xff]  ;;  %v101_v24 = vpack.c.bf16 %v72_v21, %v71_v20  ;;  %v74_v27 = vld [vmem:[#allocation2 + $0x38] sm:$0xff]  ;;  %v89_v28 = vld [vmem:[#allocation2 + $0xb0] sm:$0xff] }
  0x16   :  { %v109_v25 = vpack.c.bf16 %v88_v23, %v87_v22  ;;  %v90_v29 = vld [vmem:[#allocation2 + $0xb8] sm:$0xff]  ;;  %v102_v30 = vpack.c.bf16 %v74_v27, %v73_v26  ;;  %v75_v32 = vld [vmem:[#allocation2 + $0x40] sm:$0xff]  ;;  %v76_v33 = vld [vmem:[#allocation2 + $0x48] sm:$0xff] }
  0x17   :  { %185 = vmatpush.bf16.msra.mxu0 %v584_v2  ;;  %597 = vmatpush.bf16.msra.mxu2 %v584_v2  ;;  %v110_v31 = vpack.c.bf16 %v90_v29, %v89_v28  ;;  %v91_v34 = vld [vmem:[#allocation2 + $0xc0] sm:$0xff]  ;;  %v92_v35 = vld [vmem:[#allocation2 + $0xc8] sm:$0xff]  ;;  %v103_v36 = vpack.c.bf16 %v76_v33, %v75_v32  ;;  %v594_v38 = vld [vmem:[#allocation6 + $0x38] sm:$0xff] }
  0x18   :  { %v111_v37 = vpack.c.bf16 %v92_v35, %v91_v34  ;;  %388 = vmatpush.bf16.msra.mxu1 %v594_v38  ;;  %603 = vmatpush.bf16.msra.mxu3 %v594_v38  ;;  %v77_v39 = vld [vmem:[#allocation2 + $0x50] sm:$0xff]  ;;  %v78_v40 = vld [vmem:[#allocation2 + $0x58] sm:$0xff]  ;;  %v592_v46 = vld [vmem:[#allocation6 + $0x28] sm:$0xff] }
  0x19   :  { %v93_v41 = vld [vmem:[#allocation2 + $0xd0] sm:$0xff]  ;;  %v94_v42 = vld [vmem:[#allocation2 + $0xd8] sm:$0xff]  ;;  %v104_v43 = vpack.c.bf16 %v78_v40, %v77_v39  ;;  %v591_v47 = vld [vmem:[#allocation6 + $0x20] sm:$0xff] }
  0x1a   :  { %v112_v44 = vpack.c.bf16 %v94_v42, %v93_v41  ;;  %v593_v45 = vld [vmem:[#allocation6 + $0x30] sm:$0xff]  ;;  %v79_v48 = vld [vmem:[#allocation2 + $0x60] sm:$0xff]  ;;  %v80_v49 = vld [vmem:[#allocation2 + $0x68] sm:$0xff] }
  0x1b   :  { %186 = vmatpush.bf16.msra.mxu0 %v583_v3  ;;  %598 = vmatpush.bf16.msra.mxu2 %v583_v3  ;;  %v95_v50 = vld [vmem:[#allocation2 + $0xe0] sm:$0xff]  ;;  %v96_v51 = vld [vmem:[#allocation2 + $0xe8] sm:$0xff]  ;;  %v590_v52 = vld [vmem:[#allocation6 + $0x18] sm:$0xff]  ;;  %v105_v53 = vpack.c.bf16 %v80_v49, %v79_v48 }
  0x1c   :  { %389 = vmatpush.bf16.msra.mxu1 %v593_v45  ;;  %604 = vmatpush.bf16.msra.mxu3 %v593_v45  ;;  %v113_v54 = vpack.c.bf16 %v96_v51, %v95_v50  ;;  %v589_v55 = vld [vmem:[#allocation6 + $0x10] sm:$0xff]  ;;  %v588_v56 = vld [vmem:[#allocation6 + $0x8] sm:$0xff]  ;;  %v587_v57 = vld [vmem:[#allocation6] sm:$0xff] }
  0x1d   :  { %v81_v58 = vld [vmem:[#allocation2 + $0x70] sm:$0xff]  ;;  %v82_v59 = vld [vmem:[#allocation2 + $0x78] sm:$0xff]  ;;  %v745_v1 = vld [vmem:[%s914_s2] ss:$0 sm:$0xff] }
  0x1e   :  { %v97_v60 = vld [vmem:[#allocation2 + $0xf0] sm:$0xff]  ;;  %v98_v61 = vld [vmem:[#allocation2 + $0xf8] sm:$0xff]  ;;  %v106_v62 = vpack.c.bf16 %v82_v59, %v81_v58 }
  0x1f   :  { %187 = vmatpush.bf16.msra.mxu0 %v582_v4  ;;  %599 = vmatpush.bf16.msra.mxu2 %v582_v4  ;;  %v114_v63 = vpack.c.bf16 %v98_v61, %v97_v60 }
  0x20   :  { %390 = vmatpush.bf16.msra.mxu1 %v592_v46  ;;  %605 = vmatpush.bf16.msra.mxu3 %v592_v46 }
  0x23   :  { %188 = vmatpush.bf16.msra.mxu0 %v581_v5  ;;  %600 = vmatpush.bf16.msra.mxu2 %v581_v5 }
  0x24   :  { %391 = vmatpush.bf16.msra.mxu1 %v591_v47  ;;  %606 = vmatpush.bf16.msra.mxu3 %v591_v47 }
  0x27   :  { %189 = vmatpush.bf16.msra.mxu0 %v580_v6  ;;  %601 = vmatpush.bf16.msra.mxu2 %v580_v6 }
  0x28   :  { %392 = vmatpush.bf16.msra.mxu1 %v590_v52  ;;  %607 = vmatpush.bf16.msra.mxu3 %v590_v52 }
  0x2b   :  { %190 = vmatpush.bf16.msra.mxu0 %v579_v7  ;;  %602 = vmatpush.bf16.msra.mxu2 %v579_v7 }
  0x2c   :  { %393 = vmatpush.bf16.msra.mxu1 %v589_v55  ;;  %608 = vmatpush.bf16.msra.mxu3 %v589_v55 }
  0x2e   :  { %191 = vmatmul.bf16.vlgmr.msra.gmra.mxu0 %v99_v12  ;;  %231 = vmatmul.bf16.vlgmr.msra.gmra.mxu2 %v107_v13 }
  0x30   :  { %394 = vmatpush.bf16.msra.mxu1 %v588_v56  ;;  %609 = vmatpush.bf16.msra.mxu3 %v588_v56 }
  0x34   :  { %395 = vmatpush.bf16.msra.mxu1 %v587_v57  ;;  %610 = vmatpush.bf16.msra.mxu3 %v587_v57 }
  0x3e   :  { %196 = vmatmul.bf16.gmra.mxu0 %v100_v18  ;;  %236 = vmatmul.bf16.gmra.mxu2 %v108_v19 }
  0x4e   :  { %201 = vmatmul.bf16.gmra.mxu0 %v101_v24  ;;  %241 = vmatmul.bf16.gmra.mxu2 %v109_v25 }
  0x5e   :  { %206 = vmatmul.bf16.gmra.mxu0 %v102_v30  ;;  %246 = vmatmul.bf16.gmra.mxu2 %v110_v31 }
  0x6e   :  { %211 = vmatmul.bf16.gmra.mxu0 %v103_v36  ;;  %251 = vmatmul.bf16.gmra.mxu2 %v111_v37 }
  0x7e   :  { %216 = vmatmul.bf16.gmra.mxu0 %v104_v43  ;;  %256 = vmatmul.bf16.gmra.mxu2 %v112_v44 }
  0x8e   :  { %221 = vmatmul.bf16.gmra.mxu0 %v105_v53  ;;  %261 = vmatmul.bf16.gmra.mxu2 %v113_v54 }
  0x9e   :  { %226 = vmatmul.bf16.gmra.mxu0 %v106_v62  ;;  %266 = vmatmul.bf16.gmra.mxu2 %v114_v63 }
  0xab   :  { %v192_v0 = vpop.f32.mrf.mxu0 }
  0xac   :  { %v193_v2 = vadd.f32 %v745_v1, %v192_v0 }
  0xae   :  { %v272_v5 = vmax.f32 %v193_v2, 0.0 }
  0xb1   :  { %v232_v3 = vpop.f32.mrf.mxu2 }
  0xb2   :  { %v233_v8 = vadd.f32 %v745_v1, %v232_v3 }
  0xb3   :  { %v194_v4 = vpop.f32.mrf.mxu0 }
  0xb4   :  { %v195_v6 = vadd.f32 %v745_v1, %v194_v4  ;;  %v288_v13 = vmax.f32 %v233_v8, 0.0 }
  0xb6   :  { %v273_v7 = vmax.f32 %v195_v6, 0.0 }
  0xb8   :  { %v304_v9 = vpack.c.bf16 %v273_v7, %v272_v5 }
  0xb9   :  { %v234_v10 = vpop.f32.mrf.mxu2 }
  0xba   :  { %v235_v11 = vadd.f32 %v745_v1, %v234_v10  ;;  %396 = vmatmul.bf16.vlgmr.msra.gmra.mxu1 %v304_v9 }
  0xbb   :  { %v197_v12 = vpop.f32.mrf.mxu0 }
  0xbc   :  { %v289_v14 = vmax.f32 %v235_v11, 0.0  ;;  %v198_v16 = vadd.f32 %v745_v1, %v197_v12 }
  0xbe   :  { %v312_v15 = vpack.c.bf16 %v289_v14, %v288_v13  ;;  %v274_v19 = vmax.f32 %v198_v16, 0.0 }
  0xc0   :  { %436 = vmatmul.bf16.vlgmr.msra.gmra.mxu3 %v312_v15 }
  0xc1   :  { %v237_v17 = vpop.f32.mrf.mxu2 }
  0xc2   :  { %v238_v22 = vadd.f32 %v745_v1, %v237_v17 }
  0xc3   :  { %v199_v18 = vpop.f32.mrf.mxu0 }
  0xc4   :  { %v200_v20 = vadd.f32 %v745_v1, %v199_v18  ;;  %v290_v27 = vmax.f32 %v238_v22, 0.0 }
  0xc6   :  { %v275_v21 = vmax.f32 %v200_v20, 0.0 }
  0xc8   :  { %v305_v23 = vpack.c.bf16 %v275_v21, %v274_v19 }
  0xc9   :  { %v239_v24 = vpop.f32.mrf.mxu2 }
  0xca   :  { %v240_v25 = vadd.f32 %v745_v1, %v239_v24  ;;  %401 = vmatmul.bf16.gmra.mxu1 %v305_v23 }
  0xcb   :  { %v202_v26 = vpop.f32.mrf.mxu0 }
  0xcc   :  { %v291_v28 = vmax.f32 %v240_v25, 0.0  ;;  %v203_v30 = vadd.f32 %v745_v1, %v202_v26 }
  0xce   :  { %v313_v29 = vpack.c.bf16 %v291_v28, %v290_v27  ;;  %v276_v33 = vmax.f32 %v203_v30, 0.0 }
  0xd0   :  { %441 = vmatmul.bf16.gmra.mxu3 %v313_v29 }
  0xd1   :  { %v242_v31 = vpop.f32.mrf.mxu2 }
  0xd2   :  { %v243_v36 = vadd.f32 %v745_v1, %v242_v31 }
  0xd3   :  { %v204_v32 = vpop.f32.mrf.mxu0 }
  0xd4   :  { %v205_v34 = vadd.f32 %v745_v1, %v204_v32  ;;  %v292_v41 = vmax.f32 %v243_v36, 0.0 }
  0xd6   :  { %v277_v35 = vmax.f32 %v205_v34, 0.0 }
  0xd8   :  { %v306_v37 = vpack.c.bf16 %v277_v35, %v276_v33 }
  0xd9   :  { %v244_v38 = vpop.f32.mrf.mxu2 }
  0xda   :  { %v245_v39 = vadd.f32 %v745_v1, %v244_v38  ;;  %406 = vmatmul.bf16.gmra.mxu1 %v306_v37 }
  0xdb   :  { %v207_v40 = vpop.f32.mrf.mxu0 }
  0xdc   :  { %v293_v42 = vmax.f32 %v245_v39, 0.0  ;;  %v208_v44 = vadd.f32 %v745_v1, %v207_v40 }
  0xde   :  { %v314_v43 = vpack.c.bf16 %v293_v42, %v292_v41  ;;  %v278_v47 = vmax.f32 %v208_v44, 0.0 }
  0xe0   :  { %446 = vmatmul.bf16.gmra.mxu3 %v314_v43 }
  0xe1   :  { %v247_v45 = vpop.f32.mrf.mxu2 }
  0xe2   :  { %v248_v50 = vadd.f32 %v745_v1, %v247_v45 }
  0xe3   :  { %v209_v46 = vpop.f32.mrf.mxu0 }
  0xe4   :  { %v210_v48 = vadd.f32 %v745_v1, %v209_v46  ;;  %v294_v55 = vmax.f32 %v248_v50, 0.0  ;;  %v782_v50 = vld [vmem:[%s916_s4] ss:$0 sm:$0xff] }
  0xe6   :  { %v279_v49 = vmax.f32 %v210_v48, 0.0 }
  0xe8   :  { %v307_v51 = vpack.c.bf16 %v279_v49, %v278_v47 }
  0xe9   :  { %v249_v52 = vpop.f32.mrf.mxu2 }
  0xea   :  { %v250_v53 = vadd.f32 %v745_v1, %v249_v52  ;;  %411 = vmatmul.bf16.gmra.mxu1 %v307_v51 }
  0xeb   :  { %v212_v54 = vpop.f32.mrf.mxu0 }
  0xec   :  { %v295_v56 = vmax.f32 %v250_v53, 0.0  ;;  %v213_v58 = vadd.f32 %v745_v1, %v212_v54 }
  0xee   :  { %v315_v57 = vpack.c.bf16 %v295_v56, %v294_v55  ;;  %v280_v61 = vmax.f32 %v213_v58, 0.0 }
  0xf0   :  { %451 = vmatmul.bf16.gmra.mxu3 %v315_v57 }
  0xf1   :  { %v252_v59 = vpop.f32.mrf.mxu2 }
  0xf2   :  { %v253_v0 = vadd.f32 %v745_v1, %v252_v59 }
  0xf3   :  { %v214_v60 = vpop.f32.mrf.mxu0 }
  0xf4   :  { %v215_v62 = vadd.f32 %v745_v1, %v214_v60  ;;  %v296_v6 = vmax.f32 %v253_v0, 0.0 }
  0xf6   :  { %v281_v63 = vmax.f32 %v215_v62, 0.0 }
  0xf8   :  { %v308_v2 = vpack.c.bf16 %v281_v63, %v280_v61 }
  0xf9   :  { %v254_v3 = vpop.f32.mrf.mxu2 }
  0xfa   :  { %v255_v4 = vadd.f32 %v745_v1, %v254_v3  ;;  %416 = vmatmul.bf16.gmra.mxu1 %v308_v2 }
  0xfb   :  { %v217_v5 = vpop.f32.mrf.mxu0 }
  0xfc   :  { %v297_v7 = vmax.f32 %v255_v4, 0.0  ;;  %v218_v9 = vadd.f32 %v745_v1, %v217_v5 }
  0xfe   :  { %v316_v8 = vpack.c.bf16 %v297_v7, %v296_v6  ;;  %v282_v12 = vmax.f32 %v218_v9, 0.0 }
 0x100   :  { %456 = vmatmul.bf16.gmra.mxu3 %v316_v8 }
 0x101   :  { %v257_v10 = vpop.f32.mrf.mxu2 }
 0x102   :  { %v258_v15 = vadd.f32 %v745_v1, %v257_v10 }
 0x103   :  { %v219_v11 = vpop.f32.mrf.mxu0 }
 0x104   :  { %v220_v13 = vadd.f32 %v745_v1, %v219_v11  ;;  %v298_v20 = vmax.f32 %v258_v15, 0.0 }
 0x106   :  { %v283_v14 = vmax.f32 %v220_v13, 0.0 }
 0x108   :  { %v309_v16 = vpack.c.bf16 %v283_v14, %v282_v12 }
 0x109   :  { %v259_v17 = vpop.f32.mrf.mxu2 }
 0x10a   :  { %v260_v18 = vadd.f32 %v745_v1, %v259_v17  ;;  %421 = vmatmul.bf16.gmra.mxu1 %v309_v16 }
 0x10b   :  { %v222_v19 = vpop.f32.mrf.mxu0 }
 0x10c   :  { %v299_v21 = vmax.f32 %v260_v18, 0.0  ;;  %v223_v23 = vadd.f32 %v745_v1, %v222_v19 }
 0x10e   :  { %v317_v22 = vpack.c.bf16 %v299_v21, %v298_v20  ;;  %v284_v26 = vmax.f32 %v223_v23, 0.0 }
 0x110   :  { %461 = vmatmul.bf16.gmra.mxu3 %v317_v22 }
 0x111   :  { %v262_v24 = vpop.f32.mrf.mxu2 }
 0x112   :  { %v263_v29 = vadd.f32 %v745_v1, %v262_v24 }
 0x113   :  { %v224_v25 = vpop.f32.mrf.mxu0 }
 0x114   :  { %v225_v27 = vadd.f32 %v745_v1, %v224_v25  ;;  %v300_v34 = vmax.f32 %v263_v29, 0.0 }
 0x116   :  { %v285_v28 = vmax.f32 %v225_v27, 0.0 }
 0x118   :  { %v310_v30 = vpack.c.bf16 %v285_v28, %v284_v26 }
 0x119   :  { %v264_v31 = vpop.f32.mrf.mxu2 }
 0x11a   :  { %v265_v32 = vadd.f32 %v745_v1, %v264_v31  ;;  %426 = vmatmul.bf16.gmra.mxu1 %v310_v30 }
 0x11b   :  { %v227_v33 = vpop.f32.mrf.mxu0 }
 0x11c   :  { %v301_v35 = vmax.f32 %v265_v32, 0.0  ;;  %v228_v37 = vadd.f32 %v745_v1, %v227_v33 }
 0x11e   :  { %v318_v36 = vpack.c.bf16 %v301_v35, %v300_v34  ;;  %v286_v40 = vmax.f32 %v228_v37, 0.0 }
 0x120   :  { %466 = vmatmul.bf16.gmra.mxu3 %v318_v36 }
 0x121   :  { %v267_v38 = vpop.f32.mrf.mxu2 }
 0x122   :  { %v268_v43 = vadd.f32 %v745_v1, %v267_v38 }
 0x123   :  { %v229_v39 = vpop.f32.mrf.mxu0 }
 0x124   :  { %v230_v41 = vadd.f32 %v745_v1, %v229_v39  ;;  %v302_v47 = vmax.f32 %v268_v43, 0.0 }
 0x126   :  { %v287_v42 = vmax.f32 %v230_v41, 0.0 }
 0x128   :  { %v311_v44 = vpack.c.bf16 %v287_v42, %v286_v40 }
 0x129   :  { %v269_v45 = vpop.f32.mrf.mxu2 }
 0x12a   :  { %v270_v46 = vadd.f32 %v745_v1, %v269_v45  ;;  %431 = vmatmul.bf16.gmra.mxu1 %v311_v44 }
 0x12c   :  { %v303_v48 = vmax.f32 %v270_v46, 0.0 }
 0x12e   :  { %v319_v49 = vpack.c.bf16 %v303_v48, %v302_v47 }
 0x130   :  { %471 = vmatmul.bf16.gmra.mxu3 %v319_v49 }
 0x137   :  { %v397_v51 = vpop.f32.mrf.mxu1 }
 0x138   :  { %v398_v52 = vadd.f32 %v782_v50, %v397_v51 }
 0x13a   :  { %477 = vst [vmem:[%s917_s5] sm:$0xff] %v398_v52 }
 0x13f   :  { %v399_v53 = vpop.f32.mrf.mxu1 }
 0x140   :  { %v400_v1 = vadd.f32 %v782_v50, %v399_v53 }
 0x142   :  { %478 = vst [vmem:[%s917_s5 + $0x8] sm:$0xff] %v400_v1 }
 0x143   :  { %v437_v54 = vpop.f32.mrf.mxu3 }
 0x144   :  { %v438_v55 = vadd.f32 %v782_v50, %v437_v54 }
 0x146   :  { %493 = vst [vmem:[%s917_s5 + $0x80] sm:$0xff] %v438_v55 }
 0x147   :  { %v402_v56 = vpop.f32.mrf.mxu1 }
 0x148   :  { %v403_v57 = vadd.f32 %v782_v50, %v402_v56 }
 0x14a   :  { %479 = vst [vmem:[%s917_s5 + $0x10] sm:$0xff] %v403_v57 }
 0x14b   :  { %v439_v58 = vpop.f32.mrf.mxu3 }
 0x14c   :  { %v440_v59 = vadd.f32 %v782_v50, %v439_v58 }
 0x14e   :  { %494 = vst [vmem:[%s917_s5 + $0x88] sm:$0xff] %v440_v59 }
 0x14f   :  { %v404_v60 = vpop.f32.mrf.mxu1 }
 0x150   :  { %v405_v61 = vadd.f32 %v782_v50, %v404_v60 }
 0x152   :  { %480 = vst [vmem:[%s917_s5 + $0x18] sm:$0xff] %v405_v61 }
 0x153   :  { %v442_v62 = vpop.f32.mrf.mxu3 }
 0x154   :  { %v443_v63 = vadd.f32 %v782_v50, %v442_v62 }
 0x156   :  { %495 = vst [vmem:[%s917_s5 + $0x90] sm:$0xff] %v443_v63 }
 0x157   :  { %v407_v0 = vpop.f32.mrf.mxu1 }
 0x158   :  { %v408_v2 = vadd.f32 %v782_v50, %v407_v0 }
 0x15a   :  { %481 = vst [vmem:[%s917_s5 + $0x20] sm:$0xff] %v408_v2 }
 0x15b   :  { %v444_v3 = vpop.f32.mrf.mxu3 }
 0x15c   :  { %v445_v4 = vadd.f32 %v782_v50, %v444_v3 }
 0x15e   :  { %496 = vst [vmem:[%s917_s5 + $0x98] sm:$0xff] %v445_v4 }
 0x15f   :  { %v409_v5 = vpop.f32.mrf.mxu1 }
 0x160   :  { %v410_v6 = vadd.f32 %v782_v50, %v409_v5 }
 0x162   :  { %482 = vst [vmem:[%s917_s5 + $0x28] sm:$0xff] %v410_v6 }
 0x163   :  { %v447_v7 = vpop.f32.mrf.mxu3 }
 0x164   :  { %v448_v8 = vadd.f32 %v782_v50, %v447_v7 }
 0x166   :  { %497 = vst [vmem:[%s917_s5 + $0xa0] sm:$0xff] %v448_v8 }
 0x167   :  { %v412_v9 = vpop.f32.mrf.mxu1 }
 0x168   :  { %v413_v10 = vadd.f32 %v782_v50, %v412_v9 }
 0x16a   :  { %483 = vst [vmem:[%s917_s5 + $0x30] sm:$0xff] %v413_v10 }
 0x16b   :  { %v449_v11 = vpop.f32.mrf.mxu3 }
 0x16c   :  { %v450_v12 = vadd.f32 %v782_v50, %v449_v11 }
 0x16e   :  { %498 = vst [vmem:[%s917_s5 + $0xa8] sm:$0xff] %v450_v12 }
 0x16f   :  { %v414_v13 = vpop.f32.mrf.mxu1 }
 0x170   :  { %v415_v14 = vadd.f32 %v782_v50, %v414_v13 }
 0x172   :  { %484 = vst [vmem:[%s917_s5 + $0x38] sm:$0xff] %v415_v14 }
 0x173   :  { %v452_v15 = vpop.f32.mrf.mxu3 }
 0x174   :  { %v453_v16 = vadd.f32 %v782_v50, %v452_v15 }
 0x176   :  { %499 = vst [vmem:[%s917_s5 + $0xb0] sm:$0xff] %v453_v16 }
 0x177   :  { %v417_v17 = vpop.f32.mrf.mxu1 }
 0x178   :  { %v418_v18 = vadd.f32 %v782_v50, %v417_v17 }
 0x17a   :  { %485 = vst [vmem:[%s917_s5 + $0x40] sm:$0xff] %v418_v18 }
 0x17b   :  { %v454_v19 = vpop.f32.mrf.mxu3 }
 0x17c   :  { %v455_v20 = vadd.f32 %v782_v50, %v454_v19 }
 0x17e   :  { %500 = vst [vmem:[%s917_s5 + $0xb8] sm:$0xff] %v455_v20 }
 0x17f   :  { %v419_v21 = vpop.f32.mrf.mxu1 }
 0x180   :  { %v420_v22 = vadd.f32 %v782_v50, %v419_v21 }
 0x182   :  { %486 = vst [vmem:[%s917_s5 + $0x48] sm:$0xff] %v420_v22 }
 0x183   :  { %v457_v23 = vpop.f32.mrf.mxu3 }
 0x184   :  { %v458_v24 = vadd.f32 %v782_v50, %v457_v23 }
 0x186   :  { %501 = vst [vmem:[%s917_s5 + $0xc0] sm:$0xff] %v458_v24 }
 0x187   :  { %v422_v25 = vpop.f32.mrf.mxu1 }
 0x188   :  { %v423_v26 = vadd.f32 %v782_v50, %v422_v25 }
 0x18a   :  { %487 = vst [vmem:[%s917_s5 + $0x50] sm:$0xff] %v423_v26 }
 0x18b   :  { %v459_v27 = vpop.f32.mrf.mxu3 }
 0x18c   :  { %v460_v28 = vadd.f32 %v782_v50, %v459_v27 }
 0x18e   :  { %502 = vst [vmem:[%s917_s5 + $0xc8] sm:$0xff] %v460_v28 }
 0x18f   :  { %v424_v29 = vpop.f32.mrf.mxu1 }
 0x190   :  { %v425_v30 = vadd.f32 %v782_v50, %v424_v29 }
 0x192   :  { %488 = vst [vmem:[%s917_s5 + $0x58] sm:$0xff] %v425_v30 }
 0x193   :  { %v462_v31 = vpop.f32.mrf.mxu3 }
 0x194   :  { %v463_v32 = vadd.f32 %v782_v50, %v462_v31 }
 0x196   :  { %503 = vst [vmem:[%s917_s5 + $0xd0] sm:$0xff] %v463_v32 }
 0x197   :  { %v427_v33 = vpop.f32.mrf.mxu1 }
 0x198   :  { %v428_v34 = vadd.f32 %v782_v50, %v427_v33 }
 0x19a   :  { %489 = vst [vmem:[%s917_s5 + $0x60] sm:$0xff] %v428_v34 }
 0x19b   :  { %v464_v35 = vpop.f32.mrf.mxu3 }
 0x19c   :  { %v465_v36 = vadd.f32 %v782_v50, %v464_v35 }
 0x19e   :  { %504 = vst [vmem:[%s917_s5 + $0xd8] sm:$0xff] %v465_v36 }
 0x19f   :  { %v429_v37 = vpop.f32.mrf.mxu1 }
 0x1a0   :  { %v430_v38 = vadd.f32 %v782_v50, %v429_v37 }
 0x1a2   :  { %490 = vst [vmem:[%s917_s5 + $0x68] sm:$0xff] %v430_v38 }
 0x1a3   :  { %v467_v39 = vpop.f32.mrf.mxu3 }
 0x1a4   :  { %v468_v40 = vadd.f32 %v782_v50, %v467_v39 }
 0x1a6   :  { %505 = vst [vmem:[%s917_s5 + $0xe0] sm:$0xff] %v468_v40 }
 0x1a7   :  { %v432_v41 = vpop.f32.mrf.mxu1 }
 0x1a8   :  { %v433_v42 = vadd.f32 %v782_v50, %v432_v41 }
 0x1aa   :  { %491 = vst [vmem:[%s917_s5 + $0x70] sm:$0xff] %v433_v42 }
 0x1ab   :  { %v469_v43 = vpop.f32.mrf.mxu3 }
 0x1ac   :  { %v470_v44 = vadd.f32 %v782_v50, %v469_v43 }
 0x1ae   :  { %506 = vst [vmem:[%s917_s5 + $0xe8] sm:$0xff] %v470_v44 }
 0x1af   :  { %v434_v45 = vpop.f32.mrf.mxu1 }
 0x1b0   :  { %v435_v46 = vadd.f32 %v782_v50, %v434_v45 }
 0x1b2   :  { %492 = vst [vmem:[%s917_s5 + $0x78] sm:$0xff] %v435_v46 }
 0x1b3   :  { %v472_v47 = vpop.f32.mrf.mxu3 }
 0x1b4   :  { %v473_v48 = vadd.f32 %v782_v50, %v472_v47 }
 0x1b6   :  { %507 = vst [vmem:[%s917_s5 + $0xf0] sm:$0xff] %v473_v48 }
 0x1bb   :  { %v474_v49 = vpop.f32.mrf.mxu3 }
 0x1bc   :  { %v475_v51 = vadd.f32 %v782_v50, %v474_v49 }
 0x1be   :  { %508 = vst [vmem:[%s917_s5 + $0xf8] sm:$0xff] %v475_v51 }
 0x1bf   :  { %513 = vsyncpa [#allocation3], 1 }
 0x1c0   :  { %514 = vsyncpa [#allocation5], 1 }

</bundles_post_ra>
